<compile_context>
chip_gen: v5e
topology: v5e:2x2
jax: 0.10.0
libtpu: 0.0.40
codegen_flags: <defaults>
</compile_context>

<pallas_src>
import jax
import jax.numpy as jnp
from jax.experimental import pallas as pl
from jax.experimental.pallas import tpu as pltpu

_LANES = 128
_MIB = 1024 * 1024


def _round_up(x: int, m: int) -> int:
    return ((x + m - 1) // m) * m


def _is_v7x() -> bool:
    try:
        kind = jax.devices()[0].device_kind.lower()
    except Exception:
        return False
    return "7" in kind


def ace_loss(pred: jax.Array, target: jax.Array, *, n_splits: int | None = None,
             block_bytes: int | None = None,
             vmem_limit_bytes: int | None = None) -> jax.Array:
    """Batch-averaged ACE loss: mean_b ||pred_b - target_b||_2 / ||target_b||_2."""
    assert pred.shape == target.shape and pred.ndim == 2
    B, S = pred.shape
    itemsize = max(jnp.dtype(pred.dtype).itemsize, jnp.dtype(target.dtype).itemsize)
    min_itemsize = min(jnp.dtype(pred.dtype).itemsize, jnp.dtype(target.dtype).itemsize)
    sub = 8 if min_itemsize >= 4 else 16            # sublane packing: f32 vs bf16/f16

    # ---- per-generation defaults --------------------------------------------
    v7x = _is_v7x()
    if n_splits is None:
        n_splits = 2 if v7x else 1                  # v5e/v6e: single TensorCore
    if block_bytes is None:
        block_bytes = (8 if v7x else 4) * _MIB      # bigger steps on v7x (3.2 TB/s)
    if vmem_limit_bytes is None:
        vmem_limit_bytes = (48 if v7x else 32) * _MIB

    # ---- lane-dense (B, R, 128) view: free bitcast when S % 128 == 0 ----------
    if S % _LANES != 0:
        # TODO(synk): only remaining copy; a fully copy-free ragged tail needs a
        # 2D (B, tile_s)-blocked kernel variant.  Pad is <=127 zeros per row.
        pad = _round_up(S, _LANES) - S
        pred = jnp.pad(pred, ((0, 0), (0, pad)))
        target = jnp.pad(target, ((0, 0), (0, pad)))
    R = pred.shape[1] // _LANES                     # 128-lane rows per batch row
    pred3 = pred.reshape(B, R, _LANES)
    tgt3 = target.reshape(B, R, _LANES)

    # ---- tile sizing: 2 inputs x 2 pipeline buffers inside the VMEM budget ----
    vmem_budget = (vmem_limit_bytes * 3) // 4       # headroom for outputs/metadata
    row_bytes = B * _LANES * itemsize               # one (B, 1, 128) row of input
    tile_r = min(block_bytes // row_bytes, vmem_budget // (4 * row_bytes))
    tile_r = (tile_r // sub) * sub
    if tile_r < sub:
        # TODO(synk): add a batch-tiled grid axis instead of failing for huge B.
        raise ValueError(
            f"batch={B} too large: minimum ({B},{sub},{_LANES}) block exceeds "
            f"the {vmem_budget >> 20} MiB VMEM budget")
    tile_r = min(tile_r, _round_up(R, sub))         # don't exceed the data

    steps_total = pl.cdiv(R, tile_r)                # no rounding to tile_r*n_splits
    n_splits = max(1, min(n_splits, steps_total))
    steps_per_split = pl.cdiv(steps_total, n_splits)
    last_block = steps_total - 1

    def kernel(pred_ref, tgt_ref, num_ref, den_ref):
        s = pl.program_id(0)                        # split (parallel) axis
        k = pl.program_id(1)                        # reduction axis

        @pl.when(k == 0)
        def _init():
            num_ref[...] = jnp.zeros_like(num_ref)
            den_ref[...] = jnp.zeros_like(den_ref)

        p = pred_ref[...].astype(jnp.float32)       # (B, tile_r, 128)
        t = tgt_ref[...].astype(jnp.float32)
        row0 = (s * steps_per_split + k) * tile_r   # true (unclamped) row offset

        def accum(pv, tv):
            d = pv - tv
            # Keep the sublane axis: fold row-groups with plain vreg adds into a
            # (B, 8, 128) slab; cross-sublane/lane reduce happens in the epilogue.
            dd = (d * d).reshape(B, tile_r // 8, 8, _LANES).sum(axis=1)
            tt = (tv * tv).reshape(B, tile_r // 8, 8, _LANES).sum(axis=1)
            num_ref[...] += dd[None]
            den_ref[...] += tt[None]

        @pl.when(row0 + tile_r <= R)                # interior block: no mask
        def _full():
            accum(p, t)

        @pl.when(row0 + tile_r > R)                 # ragged / duplicated edge block
        def _edge():
            i = jax.lax.broadcasted_iota(jnp.int32, (1, tile_r, _LANES), 1)
            ok = (row0 + i) < R                     # masks OOB rows AND clamped dups
            accum(jnp.where(ok, p, 0.0), jnp.where(ok, t, 0.0))

    # Clamp the DMA block index so a duplicated tail step never reads past HBM;
    # the kernel masks its contribution to zero using the unclamped index.
    in_spec = pl.BlockSpec(
        (B, tile_r, _LANES),
        lambda s, k: (0, jnp.minimum(s * steps_per_split + k, last_block), 0))
    out_spec = pl.BlockSpec((1, B, 8, _LANES), lambda s, k: (s, 0, 0, 0))

    num_part, den_part = pl.pallas_call(
        kernel,
        out_shape=(
            jax.ShapeDtypeStruct((n_splits, B, 8, _LANES), jnp.float32),
            jax.ShapeDtypeStruct((n_splits, B, 8, _LANES), jnp.float32),
        ),
        grid_spec=pltpu.PrefetchScalarGridSpec(
            num_scalar_prefetch=0,
            grid=(n_splits, steps_per_split),
            in_specs=[in_spec, in_spec],
            out_specs=[out_spec, out_spec],
        ),
        compiler_params=pltpu.CompilerParams(
            dimension_semantics=("parallel", "arbitrary"),
            vmem_limit_bytes=vmem_limit_bytes,
        ),
    )(pred3, tgt3)

    # One-time XLA epilogue (free vs. streaming cost): reduce the lane-dense
    # partials, sqrt, divide, batch mean.  Matches PyTorch exactly, including
    # inf/nan behaviour for all-zero target rows.
    num = jnp.sqrt(jnp.sum(num_part, axis=(0, 2, 3)))   # (B,)
    den = jnp.sqrt(jnp.sum(den_part, axis=(0, 2, 3)))   # (B,)
    return jnp.mean(num / den)


def _ace_loss_ref(pred, target):
    num = jnp.sqrt(jnp.sum((pred - target) ** 2, axis=1))
    den = jnp.sqrt(jnp.sum(target ** 2, axis=1))
    return jnp.mean(num / den)


if __name__ == "__main__":
    key = jax.random.PRNGKey(0)
    k1, k2 = jax.random.split(key)
    B, S = 2, 256  # (batch_size, sample_size)
    pred = jax.random.normal(k1, (B, S), dtype=jnp.float32)
    target = jax.random.normal(k2, (B, S), dtype=jnp.float32) + 1.0

    loss = jax.block_until_ready(ace_loss(pred, target))
    ref = _ace_loss_ref(pred, target)

    assert jnp.allclose(loss, ref, rtol=1e-5, atol=1e-6), (loss, ref)
    print("KERNEL_OK")
</pallas_src>

<mosaic_0001>
module attributes {stable_mosaic.version = 11 : i64} {
  func.func @kernel(%arg0: i32, %arg1: i32, %arg2: memref<2x8x128xf32, #tpu.memory_space<vmem>>, %arg3: memref<2x8x128xf32, #tpu.memory_space<vmem>>, %arg4: memref<1x2x8x128xf32, #tpu.memory_space<vmem>>, %arg5: memref<1x2x8x128xf32, #tpu.memory_space<vmem>>) attributes {dimension_semantics = [#tpu.dimension_semantics<parallel>, #tpu.dimension_semantics<arbitrary>], iteration_bounds = array<i64: 1, 1>, scalar_prefetch = 0 : i64, scratch_operands = 0 : i64, tpu.core_type = #tpu.core_type<tc>, window_params = [{transform_indices = @transform_0, window_bounds = array<i64: 2, 8, 128>}, {transform_indices = @transform_1, window_bounds = array<i64: 2, 8, 128>}, {transform_indices = @transform_2, window_bounds = array<i64: 1, 2, 8, 128>}, {transform_indices = @transform_3, window_bounds = array<i64: 1, 2, 8, 128>}]} {
    %c0_i32 = arith.constant 0 : i32
    %0 = arith.cmpi eq, %arg1, %c0_i32 : i32
    %1 = arith.extui %0 : i1 to i32
    %c0_i32_0 = arith.constant 0 : i32
    %2 = arith.cmpi ne, %1, %c0_i32_0 : i32
    scf.if %2 {
      %cst = arith.constant 0.000000e+00 : f32
      %16 = vector.broadcast %cst : f32 to vector<1x2x8x128xf32>
      %c0_11 = arith.constant 0 : index
      %c0_12 = arith.constant 0 : index
      %c0_13 = arith.constant 0 : index
      %c0_14 = arith.constant 0 : index
      %17 = vector.load %arg4[%c0_11, %c0_12, %c0_13, %c0_14] : memref<1x2x8x128xf32, #tpu.memory_space<vmem>>, vector<1x2x8x128xf32>
      tpu.vector_store %arg4[%c0_11, %c0_12, %c0_13, %c0_14], %16 {strides = array<i32>} : memref<1x2x8x128xf32, #tpu.memory_space<vmem>>, vector<1x2x8x128xf32>,
      %cst_15 = arith.constant 0.000000e+00 : f32
      %18 = vector.broadcast %cst_15 : f32 to vector<1x2x8x128xf32>
      %c0_16 = arith.constant 0 : index
      %c0_17 = arith.constant 0 : index
      %c0_18 = arith.constant 0 : index
      %c0_19 = arith.constant 0 : index
      %19 = vector.load %arg5[%c0_16, %c0_17, %c0_18, %c0_19] : memref<1x2x8x128xf32, #tpu.memory_space<vmem>>, vector<1x2x8x128xf32>
      tpu.vector_store %arg5[%c0_16, %c0_17, %c0_18, %c0_19], %18 {strides = array<i32>} : memref<1x2x8x128xf32, #tpu.memory_space<vmem>>, vector<1x2x8x128xf32>,
    } else {
    }
    %c0 = arith.constant 0 : index
    %c0_1 = arith.constant 0 : index
    %c0_2 = arith.constant 0 : index
    %3 = vector.load %arg2[%c0, %c0_1, %c0_2] : memref<2x8x128xf32, #tpu.memory_space<vmem>>, vector<2x8x128xf32>
    %c0_3 = arith.constant 0 : index
    %c0_4 = arith.constant 0 : index
    %c0_5 = arith.constant 0 : index
    %4 = vector.load %arg3[%c0_3, %c0_4, %c0_5] : memref<2x8x128xf32, #tpu.memory_space<vmem>>, vector<2x8x128xf32>
    %c1_i32 = arith.constant 1 : i32
    %5 = arith.muli %arg0, %c1_i32 : i32
    %6 = arith.addi %5, %arg1 : i32
    %c8_i32 = arith.constant 8 : i32
    %7 = arith.muli %6, %c8_i32 : i32
    %c8_i32_6 = arith.constant 8 : i32
    %8 = arith.addi %7, %c8_i32_6 : i32
    %c2_i32 = arith.constant 2 : i32
    %9 = arith.cmpi sle, %8, %c2_i32 : i32
    %10 = arith.extui %9 : i1 to i32
    %c0_i32_7 = arith.constant 0 : i32
    %11 = arith.cmpi ne, %10, %c0_i32_7 : i32
    scf.if %11 {
      %16 = arith.subf %3, %4 : vector<2x8x128xf32>
      %17 = arith.mulf %16, %16 : vector<2x8x128xf32>
      %18 = vector.shape_cast %17 : vector<2x8x128xf32> to vector<2x1x8x128xf32>
      %cst = arith.constant dense<0.000000e+00> : vector<2x8x128xf32>
      %19 = vector.multi_reduction <add>, %18, %cst [1] : vector<2x1x8x128xf32> to vector<2x8x128xf32>
      %20 = arith.mulf %4, %4 : vector<2x8x128xf32>
      %21 = vector.shape_cast %20 : vector<2x8x128xf32> to vector<2x1x8x128xf32>
      %cst_11 = arith.constant dense<0.000000e+00> : vector<2x8x128xf32>
      %22 = vector.multi_reduction <add>, %21, %cst_11 [1] : vector<2x1x8x128xf32> to vector<2x8x128xf32>
      %c0_12 = arith.constant 0 : index
      %c0_13 = arith.constant 0 : index
      %c0_14 = arith.constant 0 : index
      %c0_15 = arith.constant 0 : index
      %23 = vector.load %arg4[%c0_12, %c0_13, %c0_14, %c0_15] : memref<1x2x8x128xf32, #tpu.memory_space<vmem>>, vector<1x2x8x128xf32>
      %24 = vector.shape_cast %19 : vector<2x8x128xf32> to vector<1x2x8x128xf32>
      %25 = arith.addf %23, %24 : vector<1x2x8x128xf32>
      %c0_16 = arith.constant 0 : index
      %c0_17 = arith.constant 0 : index
      %c0_18 = arith.constant 0 : index
      %c0_19 = arith.constant 0 : index
      %26 = vector.load %arg4[%c0_16, %c0_17, %c0_18, %c0_19] : memref<1x2x8x128xf32, #tpu.memory_space<vmem>>, vector<1x2x8x128xf32>
      tpu.vector_store %arg4[%c0_16, %c0_17, %c0_18, %c0_19], %25 {strides = array<i32>} : memref<1x2x8x128xf32, #tpu.memory_space<vmem>>, vector<1x2x8x128xf32>,
      %c0_20 = arith.constant 0 : index
      %c0_21 = arith.constant 0 : index
      %c0_22 = arith.constant 0 : index
      %c0_23 = arith.constant 0 : index
      %27 = vector.load %arg5[%c0_20, %c0_21, %c0_22, %c0_23] : memref<1x2x8x128xf32, #tpu.memory_space<vmem>>, vector<1x2x8x128xf32>
      %28 = vector.shape_cast %22 : vector<2x8x128xf32> to vector<1x2x8x128xf32>
      %29 = arith.addf %27, %28 : vector<1x2x8x128xf32>
      %c0_24 = arith.constant 0 : index
      %c0_25 = arith.constant 0 : index
      %c0_26 = arith.constant 0 : index
      %c0_27 = arith.constant 0 : index
      %30 = vector.load %arg5[%c0_24, %c0_25, %c0_26, %c0_27] : memref<1x2x8x128xf32, #tpu.memory_space<vmem>>, vector<1x2x8x128xf32>
      tpu.vector_store %arg5[%c0_24, %c0_25, %c0_26, %c0_27], %29 {strides = array<i32>} : memref<1x2x8x128xf32, #tpu.memory_space<vmem>>, vector<1x2x8x128xf32>,
    } else {
    }
    %c8_i32_8 = arith.constant 8 : i32
    %12 = arith.addi %7, %c8_i32_8 : i32
    %c2_i32_9 = arith.constant 2 : i32
    %13 = arith.cmpi sgt, %12, %c2_i32_9 : i32
    %14 = arith.extui %13 : i1 to i32
    %c0_i32_10 = arith.constant 0 : i32
    %15 = arith.cmpi ne, %14, %c0_i32_10 : i32
    scf.if %15 {
      %16 = tpu.iota {dimensions = array<i32: 1>} : vector<1x8x128xi32>
      %17 = vector.broadcast %7 : i32 to vector<1x8x128xi32>
      %18 = arith.addi %17, %16 : vector<1x8x128xi32>
      %c2_i32_11 = arith.constant 2 : i32
      %19 = vector.broadcast %c2_i32_11 : i32 to vector<1x8x128xi32>
      %20 = arith.cmpi slt, %18, %19 : vector<1x8x128xi32>
      %cst = arith.constant 0.000000e+00 : f32
      %21 = vector.shape_cast %20 : vector<1x8x128xi1> to vector<1x8x128xi1>
      %22 = vector.broadcast %21 : vector<1x8x128xi1> to vector<2x8x128xi1>
      %23 = vector.broadcast %cst : f32 to vector<2x8x128xf32>
      %24 = arith.select %22, %3, %23 : vector<2x8x128xi1>, vector<2x8x128xf32>
      %cst_12 = arith.constant 0.000000e+00 : f32
      %25 = vector.shape_cast %20 : vector<1x8x128xi1> to vector<1x8x128xi1>
      %26 = vector.broadcast %25 : vector<1x8x128xi1> to vector<2x8x128xi1>
      %27 = vector.broadcast %cst_12 : f32 to vector<2x8x128xf32>
      %28 = arith.select %26, %4, %27 : vector<2x8x128xi1>, vector<2x8x128xf32>
      %29 = arith.subf %24, %28 : vector<2x8x128xf32>
      %30 = arith.mulf %29, %29 : vector<2x8x128xf32>
      %31 = vector.shape_cast %30 : vector<2x8x128xf32> to vector<2x1x8x128xf32>
      %cst_13 = arith.constant dense<0.000000e+00> : vector<2x8x128xf32>
      %32 = vector.multi_reduction <add>, %31, %cst_13 [1] : vector<2x1x8x128xf32> to vector<2x8x128xf32>
      %33 = arith.mulf %28, %28 : vector<2x8x128xf32>
      %34 = vector.shape_cast %33 : vector<2x8x128xf32> to vector<2x1x8x128xf32>
      %cst_14 = arith.constant dense<0.000000e+00> : vector<2x8x128xf32>
      %35 = vector.multi_reduction <add>, %34, %cst_14 [1] : vector<2x1x8x128xf32> to vector<2x8x128xf32>
      %c0_15 = arith.constant 0 : index
      %c0_16 = arith.constant 0 : index
      %c0_17 = arith.constant 0 : index
      %c0_18 = arith.constant 0 : index
      %36 = vector.load %arg4[%c0_15, %c0_16, %c0_17, %c0_18] : memref<1x2x8x128xf32, #tpu.memory_space<vmem>>, vector<1x2x8x128xf32>
      %37 = vector.shape_cast %32 : vector<2x8x128xf32> to vector<1x2x8x128xf32>
      %38 = arith.addf %36, %37 : vector<1x2x8x128xf32>
      %c0_19 = arith.constant 0 : index
      %c0_20 = arith.constant 0 : index
      %c0_21 = arith.constant 0 : index
      %c0_22 = arith.constant 0 : index
      %39 = vector.load %arg4[%c0_19, %c0_20, %c0_21, %c0_22] : memref<1x2x8x128xf32, #tpu.memory_space<vmem>>, vector<1x2x8x128xf32>
      tpu.vector_store %arg4[%c0_19, %c0_20, %c0_21, %c0_22], %38 {strides = array<i32>} : memref<1x2x8x128xf32, #tpu.memory_space<vmem>>, vector<1x2x8x128xf32>,
      %c0_23 = arith.constant 0 : index
      %c0_24 = arith.constant 0 : index
      %c0_25 = arith.constant 0 : index
      %c0_26 = arith.constant 0 : index
      %40 = vector.load %arg5[%c0_23, %c0_24, %c0_25, %c0_26] : memref<1x2x8x128xf32, #tpu.memory_space<vmem>>, vector<1x2x8x128xf32>
      %41 = vector.shape_cast %35 : vector<2x8x128xf32> to vector<1x2x8x128xf32>
      %42 = arith.addf %40, %41 : vector<1x2x8x128xf32>
      %c0_27 = arith.constant 0 : index
      %c0_28 = arith.constant 0 : index
      %c0_29 = arith.constant 0 : index
      %c0_30 = arith.constant 0 : index
      %43 = vector.load %arg5[%c0_27, %c0_28, %c0_29, %c0_30] : memref<1x2x8x128xf32, #tpu.memory_space<vmem>>, vector<1x2x8x128xf32>
      tpu.vector_store %arg5[%c0_27, %c0_28, %c0_29, %c0_30], %42 {strides = array<i32>} : memref<1x2x8x128xf32, #tpu.memory_space<vmem>>, vector<1x2x8x128xf32>,
    } else {
    }
    return
  }
  func.func @transform_0(%arg0: i32, %arg1: i32) -> (i32, i32, i32) {
    %c1_i32 = arith.constant 1 : i32
    %0 = arith.muli %arg0, %c1_i32 : i32
    %1 = arith.addi %0, %arg1 : i32
    %c0_i32 = arith.constant 0 : i32
    %2 = arith.minsi %1, %c0_i32 : i32
    %c0_i32_0 = arith.constant 0 : i32
    %c0_i32_1 = arith.constant 0 : i32
    %c0_i32_2 = arith.constant 0 : i32
    return %c0_i32_0, %2, %c0_i32_1 : i32, i32, i32
  }
  func.func @transform_1(%arg0: i32, %arg1: i32) -> (i32, i32, i32) {
    %c1_i32 = arith.constant 1 : i32
    %0 = arith.muli %arg0, %c1_i32 : i32
    %1 = arith.addi %0, %arg1 : i32
    %c0_i32 = arith.constant 0 : i32
    %2 = arith.minsi %1, %c0_i32 : i32
    %c0_i32_0 = arith.constant 0 : i32
    %c0_i32_1 = arith.constant 0 : i32
    %c0_i32_2 = arith.constant 0 : i32
    return %c0_i32_0, %2, %c0_i32_1 : i32, i32, i32
  }
  func.func @transform_2(%arg0: i32, %arg1: i32) -> (i32, i32, i32, i32) {
    %c0_i32 = arith.constant 0 : i32
    %c0_i32_0 = arith.constant 0 : i32
    %c0_i32_1 = arith.constant 0 : i32
    %c0_i32_2 = arith.constant 0 : i32
    return %arg0, %c0_i32, %c0_i32_0, %c0_i32_1 : i32, i32, i32, i32
  }
  func.func @transform_3(%arg0: i32, %arg1: i32) -> (i32, i32, i32, i32) {
    %c0_i32 = arith.constant 0 : i32
    %c0_i32_0 = arith.constant 0 : i32
    %c0_i32_1 = arith.constant 0 : i32
    %c0_i32_2 = arith.constant 0 : i32
    return %arg0, %c0_i32, %c0_i32_0, %c0_i32_1 : i32, i32, i32, i32
  }
}

</mosaic_0001>

<bundles_post_ra>
// kernel: tpu_custom_call.1
= control target key start
LH: loop header
LB: loop body
LE: loop exit
PB: predicated region body
PF: predicated region fallthrough
CT: control target
= control target key end

     0   :  { %9 = vsyncpa [#allocation3], 0  ;;  %s382_s0 = inlined_call_operand.hbm [shape: f32[2,2,128], index: 0, kind: input, shape index: {}]   ;;  %s383_s1 = inlined_call_operand.hbm [shape: f32[2,2,128], index: 1, kind: input, shape index: {}]   ;;  %s384_s2 = inlined_call_operand.hbm [shape: f32[1,2,8,128], index: 2, kind: output, shape index: {0}]   ;;  %s385_s3 = inlined_call_operand.hbm [shape: f32[1,2,8,128], index: 3, kind: output, shape index: {1}]  }
   0x1   :  { %10 = vsyncpa [#allocation6], 0 }
   0x2   :  { %11 = vsyncpa [#allocation4], 0 }
   0x3   :  { %12 = vsyncpa [#allocation9], 0 }
   0x4   :  { %23 = vsyncadd [#allocation3], 192  ;;  %s33_s12 = sld [smem:[#allocation0]]   ;;  %s41_s15 = sshll.u32 %s382_s0, 4  ;;  %s42_s15 = int_to_ptr.hbm [resolvable:$true] %s41_s15 }
   0x5   :  { %s332_s16 = smov [#allocation2]   ;;  %s333_s18 = smov 32  }
   0x6   :  { %s43_s17 = sshll.u32 %s332_s16, 4  ;;  %50 = sst [smem:[#allocation11]] %s333_s18  ;;  %s44_s17 = int_to_ptr.vmem [resolvable:$true] %s43_s17 }
   0x7   :  { %s334_s19 = smov 128   ;;  %s335_s21 = smov 1  }
   0x8   :  { %52 = sst [smem:[#allocation11 + $0x1]] %s334_s19  ;;  %s336_s23 = smov 2  }
   0x9   :  { %54 = sst [smem:[#allocation11 + $0x2]] %s335_s21  ;;  %s337_s24 = smov [#allocation3]  }
   0xa   :  { %s253_s20 = sshll.u32 %s33_s12, 26  ;;  %56 = sst [smem:[#allocation11 + $0x3]] %s333_s18 }
   0xb   :  { %s254_s22 = sadd.s32 134217728, %s253_s20  ;;  %58 = sst [smem:[#allocation11 + $0x4]] %s333_s18 }
   0xc   :  { %60 = sst [smem:[#allocation11 + $0x5]] %s336_s23  ;;  %s338_s25 = smov [#allocation10]  }
   0xd   :  { %62 = dma.general %s42_s15, 64, %s44_s17, %s337_s24, %s338_s25, [#allocation11], %s254_s22, 0  }
   0xe   :  { %73 = vsyncadd [#allocation6], 192  ;;  %s83_s0 = sld [smem:[#allocation0]]   ;;  %s91_s28 = sshll.u32 %s383_s1, 4  ;;  %s92_s28 = int_to_ptr.hbm [resolvable:$true] %s91_s28 }
   0xf   :  { %s339_s29 = smov [#allocation5]   ;;  %s340_s4 = smov 32  }
  0x10   :  { %s93_s30 = sshll.u32 %s339_s29, 4  ;;  %100 = sst [smem:[#allocation13]] %s340_s4  ;;  %s94_s30 = int_to_ptr.vmem [resolvable:$true] %s93_s30 }
  0x11   :  { %s341_s5 = smov 128   ;;  %s342_s7 = smov 1  }
  0x12   :  { %102 = sst [smem:[#allocation13 + $0x1]] %s341_s5  ;;  %s343_s9 = smov 2  }
  0x13   :  { %104 = sst [smem:[#allocation13 + $0x2]] %s342_s7  ;;  %s344_s10 = smov [#allocation6]  }
  0x14   :  { %s255_s6 = sshll.u32 %s83_s0, 26  ;;  %106 = sst [smem:[#allocation13 + $0x3]] %s340_s4 }
  0x15   :  { %s256_s8 = sadd.s32 134217728, %s255_s6  ;;  %108 = sst [smem:[#allocation13 + $0x4]] %s340_s4 }
  0x16   :  { %110 = sst [smem:[#allocation13 + $0x5]] %s343_s9  ;;  %s345_s11 = smov [#allocation12]  }
  0x17   :  { %112 = dma.general %s92_s28, 64, %s94_s30, %s344_s10, %s345_s11, [#allocation13], %s256_s8, 0  }
  0x18   :  { %324 = dma.done.wait [#allocation3], 256  }
  0x19   :  { %325 = vsyncadd [#allocation3], 4294967040 }
  0x1a   :  { %326 = dma.done.wait [#allocation6], 256  }
  0x1b   :  { %327 = vsyncadd [#allocation6], 4294967040  ;;  %v178_v0 = vlaneseq  ;;  %v141_v2 = vld [vmem:[#allocation2] sm:$0xff]  ;;  %v143_v3 = vld [vmem:[#allocation5] sm:$0xff]  ;;  %s346_s1 = smov [#allocation8]   ;;  %s230_s15 = sshll.u32 %s385_s3, 4  ;;  %s231_s15 = int_to_ptr.hbm [resolvable:$true] %s230_s15 }
  0x1c   :  { %v142_v4 = vld [vmem:[#allocation2 + $0x8] sm:$0xff]  ;;  %v144_v7 = vld [vmem:[#allocation5 + $0x8] sm:$0xff]  ;;  %s228_s12 = sshll.u32 %s346_s1, 4  ;;  %s347_s16 = smov [#allocation7]   ;;  %s229_s12 = int_to_ptr.vmem [resolvable:$true] %s228_s12 }
  0x1d   :  { %v179_v1 = vshrl.u32 %v178_v0, 7  ;;  %s215_s17 = sshll.u32 %s347_s16, 4  ;;  %s217_s20 = sshll.u32 %s384_s2, 4  ;;  %s216_s17 = int_to_ptr.vmem [resolvable:$true] %s215_s17  ;;  %s218_s20 = int_to_ptr.hbm [resolvable:$true] %s217_s20 }
  0x1e   :  { %s348_s21 = smov 128   ;;  %s349_s22 = smov 8  }
  0x1f   :  { %vm182_vm0 = vcmp.lt.s32.totalorder %v179_v1, 2 }
  0x20   :  { %v185_v5 = vsel %vm182_vm0, %v141_v2, 0.0  ;;  %v187_v6 = vsel %vm182_vm0, %v143_v3, 0.0  ;;  %v186_v8 = vsel %vm182_vm0, %v142_v4, 0.0  ;;  %v188_v10 = vsel %vm182_vm0, %v144_v7, 0.0 }
  0x21   :  { %v189_v9 = vsub.f32 %v185_v5, %v187_v6  ;;  %v195_v11 = vmul.f32 %v187_v6, %v187_v6  ;;  %v190_v12 = vsub.f32 %v186_v8, %v188_v10  ;;  %v196_v13 = vmul.f32 %v188_v10, %v188_v10 }
  0x23   :  { %v191_v14 = vmul.f32 %v189_v9, %v189_v9  ;;  %v192_v15 = vmul.f32 %v190_v12, %v190_v12  ;;  %209 = vst [vmem:[#allocation8] sm:$0xff] %v195_v11 }
  0x24   :  { %210 = vst [vmem:[#allocation8 + $0x8] sm:$0xff] %v196_v13 }
  0x25   :  { %203 = vst [vmem:[#allocation7] sm:$0xff] %v191_v14  ;;  %236 = dma.vmem_to_hbm [thread:$0]  %s229_s12, 256, %s231_s15, [#allocation9], %s348_s21, %s348_s21, %s349_s22  }
  0x26   :  { %204 = vst [vmem:[#allocation7 + $0x8] sm:$0xff] %v192_v15 }
  0x27   :  { %223 = dma.vmem_to_hbm [thread:$0]  %s216_s17, 256, %s218_s20, [#allocation4], %s348_s21, %s348_s21, %s349_s22  }
  0x28   :  { %328 = dma.done.wait [#allocation4], 256  }
  0x29   :  { %329 = vsyncadd [#allocation4], 4294967040 }
  0x2a   :  { %330 = dma.done.wait [#allocation9], 256  }
  0x2b   :  { %331 = vsyncadd [#allocation9], 4294967040 }
  0x2c   :  { %245 = vsyncpa [#allocation3], 1 }
  0x2d   :  { %246 = vsyncpa [#allocation6], 1 }
  0x2e   :  { %247 = vsyncpa [#allocation4], 1 }
  0x2f   :  { %248 = vsyncpa [#allocation9], 1 }

</bundles_post_ra>
